<compile_context>
chip_gen: v6e
topology: v6e:2x2x1
jax: 0.10.0
libtpu: 0.0.40
codegen_flags: <defaults>
</compile_context>

<pallas_src>
import functools

import jax
import jax.numpy as jnp
from jax.experimental import pallas as pl
from jax.experimental.pallas import tpu as pltpu

EPS = 1e-5


# ---------------------------------------------------------------------------
# Kernel bodies
# ---------------------------------------------------------------------------
def _ln_body(x_ref, w_ref, b_ref, o_ref, *, fuse_stats, elemwise_native):
    x = x_ref[...]                       # (block_rows, C), input dtype
    x32 = x.astype(jnp.float32)
    inv_c = jnp.float32(1.0 / x.shape[-1])

    if fuse_stats:
        # One pass over x: sum(x) and sum(x*x) computed together; removes the
        # mean -> centered-x -> var dependency chain (one fewer full pass).
        mean = jnp.sum(x32, axis=-1, keepdims=True) * inv_c
        ex2 = jnp.sum(x32 * x32, axis=-1, keepdims=True) * inv_c
        var = jnp.maximum(ex2 - mean * mean, 0.0)
    else:
        # Two-pass (numerically safest) -- used for f32 inputs, where the
        # kernel is HBM-bound and the extra VALU work is hidden.
        mean = jnp.mean(x32, axis=-1, keepdims=True)
        xc = x32 - mean
        var = jnp.mean(xc * xc, axis=-1, keepdims=True)

    inv = jax.lax.rsqrt(var + jnp.float32(EPS))

    if elemwise_native:
        # Final elementwise math in the (narrow) input dtype: statistics stay
        # f32, per-element work uses the native bf16 VALU path on v6e/v7x and
        # avoids full-tile f32 temporaries.
        dt = x.dtype
        y = (x - mean.astype(dt)) * inv.astype(dt) * w_ref[...].astype(dt)
        if b_ref is not None:
            y = y + b_ref[...].astype(dt)
    else:
        y = (x32 - mean) * inv * w_ref[...].astype(jnp.float32)
        if b_ref is not None:
            y = y + b_ref[...].astype(jnp.float32)

    o_ref[...] = y.astype(o_ref.dtype)


def _make_ln_kernel(has_bias, fuse_stats, elemwise_native):
    if has_bias:
        def kernel(x_ref, w_ref, b_ref, o_ref):
            _ln_body(x_ref, w_ref, b_ref, o_ref,
                     fuse_stats=fuse_stats, elemwise_native=elemwise_native)
    else:
        def kernel(x_ref, w_ref, o_ref):
            _ln_body(x_ref, w_ref, None, o_ref,
                     fuse_stats=fuse_stats, elemwise_native=elemwise_native)
    return kernel


# ---------------------------------------------------------------------------
# Tiling / VMEM budgeting (evaluated at call/trace time, per device generation)
# ---------------------------------------------------------------------------
@functools.lru_cache(maxsize=None)
def _vmem_capacity_bytes():
    """Physical VMEM per TensorCore; conservative fallback if query fails."""
    try:
        info = pltpu.get_tpu_info()
        cap = getattr(info, "vmem_capacity_bytes", None)
        if cap:
            return int(cap)
    except Exception:
        pass
    return 64 * 1024 * 1024  # unknown: assume the smallest (v7x per-TC)


@functools.lru_cache(maxsize=None)
def _tile_budget():
    """(target_tile_bytes, vmem_limit_bytes) for the current TPU generation."""
    cap = _vmem_capacity_bytes()
    mib = 1024 * 1024
    if cap >= 96 * mib:
        # 128-MiB-VMEM parts (v5e/v6e): slowest HBM, purely DMA-bound ->
        # biggest tiles; raise scoped limit well past the 16/32-MiB defaults.
        return 6 * mib, 96 * mib
    # 64-MiB-per-TC parts (v7x): 4 MiB keeps per-step overhead amortized
    # (>=5 us of DMA per step at 3.2 TB/s) while double-buffered in+out plus
    # f32 temps fit the 48-MiB scoped limit with headroom.
    return 4 * mib, 48 * mib


def _sublane_pack(dtype):
    itemsize = jnp.dtype(dtype).itemsize
    if itemsize >= 4:
        return 8
    if itemsize == 2:
        return 16
    return 32


def _round_up(x, m):
    return ((x + m - 1) // m) * m


def _pick_block_rows(rows, C, dtype, target_tile_bytes):
    sub = _sublane_pack(dtype)
    itemsize = jnp.dtype(dtype).itemsize
    # Budget the f32 upcast intermediates: for sub-32-bit inputs each f32 temp
    # is 2x the tile bytes, so halve the effective tile target.
    eff_target = target_tile_bytes if itemsize >= 4 else target_tile_bytes // 2
    row_bytes = max(1, C * itemsize)

    br = eff_target // row_bytes
    br = max(sub, (br // sub) * sub)          # multiple of packed sublanes

    # Keep >= 4 grid steps when rows allow: the 'parallel' axis is what gets
    # sharded across v7x's 2 TensorCores (no-op on 1-TC v5e/v6e).
    cap = max(sub, _round_up(pl.cdiv(rows, 4), sub))
    br = min(br, cap)
    br = min(br, _round_up(rows, sub))        # never bigger than (rounded) rows
    return int(br)


# ---------------------------------------------------------------------------
# pallas_call wrapper
# ---------------------------------------------------------------------------
@functools.partial(jax.jit, static_argnames=("block_rows", "vmem_limit"))
def _layer_norm_impl(x, weight, bias, *, block_rows, vmem_limit):
    orig_shape = x.shape
    C = orig_shape[-1]
    rows = 1
    for d in orig_shape[:-1]:
        rows *= d

    x2 = x.reshape(rows, C)
    w2 = weight.reshape(1, C)

    itemsize = jnp.dtype(x.dtype).itemsize
    is_narrow_float = jnp.issubdtype(x.dtype, jnp.floating) and itemsize == 2
    fuse_stats = itemsize < 4         # one-pass stats where VALU pressure matters
    elemwise_native = is_narrow_float  # bf16/f16 elementwise path (v6e/v7x VALU)

    has_bias = bias is not None
    kernel = _make_ln_kernel(has_bias, fuse_stats, elemwise_native)

    grid = (pl.cdiv(rows, block_rows),)
    x_spec = pl.BlockSpec((block_rows, C), lambda i: (i, 0))
    wb_spec = pl.BlockSpec((1, C), lambda i: (0, 0))
    out_spec = pl.BlockSpec((block_rows, C), lambda i: (i, 0))
    out_shape = jax.ShapeDtypeStruct((rows, C), x.dtype)

    compiler_params = pltpu.CompilerParams(
        dimension_semantics=("parallel",),
        vmem_limit_bytes=vmem_limit,
    )

    in_specs = [x_spec, wb_spec] + ([wb_spec] if has_bias else [])
    operands = (x2, w2) + ((bias.reshape(1, C),) if has_bias else ())

    out = pl.pallas_call(
        kernel,
        out_shape=out_shape,
        grid_spec=pltpu.PrefetchScalarGridSpec(
            num_scalar_prefetch=0,
            grid=grid,
            in_specs=in_specs,
            out_specs=out_spec,
        ),
        compiler_params=compiler_params,
    )(*operands)

    return out.reshape(orig_shape)


def layer_norm(x, weight, bias=None, *, block_rows=None):
    """LayerNorm over the last axis of x with weight and optional bias.

    x:      (..., C)
    weight: (C,)
    bias:   (C,) or None
    """
    C = x.shape[-1]
    rows = 1
    for d in x.shape[:-1]:
        rows *= d

    target_tile_bytes, vmem_limit = _tile_budget()
    if block_rows is None:
        block_rows = _pick_block_rows(rows, C, x.dtype, target_tile_bytes)

    return _layer_norm_impl(x, weight, bias,
                            block_rows=int(block_rows),
                            vmem_limit=int(vmem_limit))


# ---------------------------------------------------------------------------
# Demo / self-check
# ---------------------------------------------------------------------------
if __name__ == "__main__":
    key = jax.random.PRNGKey(0)
    B, T, C = 2, 8, 128  # small GPT-2-ish shapes; C kept lane-dense (128)

    kx, kw, kb, kx2 = jax.random.split(key, 4)
    x = jax.random.normal(kx, (B, T, C), dtype=jnp.float32)
    # Module init is ones/zeros; use perturbed params so the check is non-trivial.
    weight = 1.0 + 0.1 * jax.random.normal(kw, (C,), dtype=jnp.float32)
    bias = 0.1 * jax.random.normal(kb, (C,), dtype=jnp.float32)

    def ref_ln(xv, w, b):
        xv = xv.astype(jnp.float32)
        w = w.astype(jnp.float32)
        mean = jnp.mean(xv, axis=-1, keepdims=True)
        var = jnp.mean((xv - mean) ** 2, axis=-1, keepdims=True)
        y = (xv - mean) / jnp.sqrt(var + EPS) * w
        return y + b.astype(jnp.float32) if b is not None else y

    # bias=True path (f32: two-pass stats, f32 elementwise)
    y = jax.block_until_ready(layer_norm(x, weight, bias))
    assert jnp.allclose(y, ref_ln(x, weight, bias), atol=1e-5, rtol=1e-5), "mismatch (bias)"

    # bias=False path (specialized 2-input kernel)
    y_nb = jax.block_until_ready(layer_norm(x, weight, None))
    assert jnp.allclose(y_nb, ref_ln(x, weight, None), atol=1e-5, rtol=1e-5), "mismatch (no bias)"

    # Partial last block (rows = 15 not a multiple of block_rows=8): no pad copy,
    # OOB rows are read-padded / write-masked by Pallas.
    x3 = jax.random.normal(kx2, (3, 5, C), dtype=jnp.float32)
    y3 = jax.block_until_ready(layer_norm(x3, weight, bias, block_rows=8))
    assert jnp.allclose(y3, ref_ln(x3, weight, bias), atol=1e-5, rtol=1e-5), "mismatch (partial block)"

    # bf16 path (fused one-pass stats + native-dtype elementwise math)
    x_bf = x.astype(jnp.bfloat16)
    w_bf = weight.astype(jnp.bfloat16)
    b_bf = bias.astype(jnp.bfloat16)
    y_bf = jax.block_until_ready(layer_norm(x_bf, w_bf, b_bf))
    ref_bf = ref_ln(x_bf, w_bf, b_bf)
    assert jnp.allclose(y_bf.astype(jnp.float32), ref_bf, atol=1e-1, rtol=5e-2), "mismatch (bf16)"

    print("KERNEL_OK")
</pallas_src>

<mosaic_0001>
module attributes {stable_mosaic.version = 11 : i64} {
  func.func @kernel(%arg0: i32, %arg1: memref<8x128xf32, #tpu.memory_space<vmem>>, %arg2: memref<1x128xf32, #tpu.memory_space<vmem>>, %arg3: memref<1x128xf32, #tpu.memory_space<vmem>>, %arg4: memref<8x128xf32, #tpu.memory_space<vmem>>) attributes {dimension_semantics = [#tpu.dimension_semantics<parallel>], iteration_bounds = array<i64: 2>, scalar_prefetch = 0 : i64, scratch_operands = 0 : i64, tpu.core_type = #tpu.core_type<tc>, window_params = [{transform_indices = @transform_0, window_bounds = array<i64: 8, 128>}, {pipeline_mode = #tpu.pipeline_mode<synchronous>, transform_indices = @transform_1, window_bounds = array<i64: 1, 128>}, {pipeline_mode = #tpu.pipeline_mode<synchronous>, transform_indices = @transform_2, window_bounds = array<i64: 1, 128>}, {transform_indices = @transform_3, window_bounds = array<i64: 8, 128>}]} {
    %c0 = arith.constant 0 : index
    %c0_0 = arith.constant 0 : index
    %0 = vector.load %arg1[%c0, %c0_0] : memref<8x128xf32, #tpu.memory_space<vmem>>, vector<8x128xf32>
    %cst = arith.constant dense<0.000000e+00> : vector<8xf32>
    %1 = vector.multi_reduction <add>, %0, %cst [1] : vector<8x128xf32> to vector<8xf32>
    %2 = vector.shape_cast %1 : vector<8xf32> to vector<8x1xf32>
    %cst_1 = arith.constant 1.280000e+02 : f32
    %3 = vector.broadcast %cst_1 : f32 to vector<8x1xf32>
    %4 = arith.divf %2, %3 : vector<8x1xf32>
    %5 = vector.broadcast %4 : vector<8x1xf32> to vector<8x128xf32>
    %6 = arith.subf %0, %5 : vector<8x128xf32>
    %7 = arith.mulf %6, %6 : vector<8x128xf32>
    %cst_2 = arith.constant dense<0.000000e+00> : vector<8xf32>
    %8 = vector.multi_reduction <add>, %7, %cst_2 [1] : vector<8x128xf32> to vector<8xf32>
    %9 = vector.shape_cast %8 : vector<8xf32> to vector<8x1xf32>
    %cst_3 = arith.constant 1.280000e+02 : f32
    %10 = vector.broadcast %cst_3 : f32 to vector<8x1xf32>
    %11 = arith.divf %9, %10 : vector<8x1xf32>
    %cst_4 = arith.constant 9.99999974E-6 : f32
    %12 = vector.broadcast %cst_4 : f32 to vector<8x1xf32>
    %13 = arith.addf %11, %12 : vector<8x1xf32>
    %14 = math.rsqrt %13 : vector<8x1xf32>
    %15 = vector.broadcast %4 : vector<8x1xf32> to vector<8x128xf32>
    %16 = arith.subf %0, %15 : vector<8x128xf32>
    %17 = vector.broadcast %14 : vector<8x1xf32> to vector<8x128xf32>
    %18 = arith.mulf %16, %17 : vector<8x128xf32>
    %c0_5 = arith.constant 0 : index
    %c0_6 = arith.constant 0 : index
    %19 = vector.load %arg2[%c0_5, %c0_6] : memref<1x128xf32, #tpu.memory_space<vmem>>, vector<1x128xf32>
    %20 = vector.broadcast %19 : vector<1x128xf32> to vector<8x128xf32>
    %21 = arith.mulf %18, %20 : vector<8x128xf32>
    %c0_7 = arith.constant 0 : index
    %c0_8 = arith.constant 0 : index
    %22 = vector.load %arg3[%c0_7, %c0_8] : memref<1x128xf32, #tpu.memory_space<vmem>>, vector<1x128xf32>
    %23 = vector.broadcast %22 : vector<1x128xf32> to vector<8x128xf32>
    %24 = arith.addf %21, %23 : vector<8x128xf32>
    %c0_9 = arith.constant 0 : index
    %c0_10 = arith.constant 0 : index
    %25 = vector.load %arg4[%c0_9, %c0_10] : memref<8x128xf32, #tpu.memory_space<vmem>>, vector<8x128xf32>
    tpu.vector_store %arg4[%c0_9, %c0_10], %24 {strides = array<i32>} : memref<8x128xf32, #tpu.memory_space<vmem>>, vector<8x128xf32>,
    return
  }
  func.func @transform_0(%arg0: i32) -> (i32, i32) {
    %c0_i32 = arith.constant 0 : i32
    %c0_i32_0 = arith.constant 0 : i32
    return %arg0, %c0_i32 : i32, i32
  }
  func.func @transform_1(%arg0: i32) -> (i32, i32) {
    %c0_i32 = arith.constant 0 : i32
    %c0_i32_0 = arith.constant 0 : i32
    %c0_i32_1 = arith.constant 0 : i32
    return %c0_i32, %c0_i32_0 : i32, i32
  }
  func.func @transform_2(%arg0: i32) -> (i32, i32) {
    %c0_i32 = arith.constant 0 : i32
    %c0_i32_0 = arith.constant 0 : i32
    %c0_i32_1 = arith.constant 0 : i32
    return %c0_i32, %c0_i32_0 : i32, i32
  }
  func.func @transform_3(%arg0: i32) -> (i32, i32) {
    %c0_i32 = arith.constant 0 : i32
    %c0_i32_0 = arith.constant 0 : i32
    return %arg0, %c0_i32 : i32, i32
  }
}

</mosaic_0001>

<bundles_post_ra>
// kernel: _layer_norm_impl.1
= control target key start
LH: loop header
LB: loop body
LE: loop exit
PB: predicated region body
PF: predicated region fallthrough
CT: control target
= control target key end

     0   :  { %8 = vsyncpa [#allocation3], 0  ;;  %s625_s0 = inlined_call_operand.hbm [shape: f32[16,128], index: 0, kind: input, shape index: {}]   ;;  %s626_s1 = inlined_call_operand.vmem [shape: f32[1,128], index: 1, kind: input, shape index: {}]   ;;  %s627_s2 = inlined_call_operand.vmem [shape: f32[1,128], index: 2, kind: input, shape index: {}]   ;;  %s628_s3 = inlined_call_operand.hbm [shape: f32[16,128], index: 3, kind: output, shape index: {}]  }
   0x1   :  { %10 = vsyncpa [#allocation3 + $0x1], 0 }
   0x2   :  { %11 = vsyncpa [#allocation4], 0 }
   0x3   :  { %13 = vsyncpa [#allocation4 + $0x1], 0  ;;  %s478_s12 = smov 0   ;;  %s480_s13 = smov 0  }
   0x4   :  { %s482_s14 = smov 0   ;;  %s484_s15 = smov 0  }
   0x5 LB: > { %s499_s16 = sadd.s32 4294967295, %s454_s15   ;;  %s300_s17 = sadd.s32 4294967294, %s454_s15   ;;  %s454_s15 = sphi %s484_s15, %s645_s15   ;;  %s450_s14 = sphi %s482_s14, %s644_s14   ;;  %s446_s13 = sphi %s480_s13, %s643_s13   ;;  %s442_s12 = sphi %s478_s12, %s642_s12  }
   0x6   : > { %s503_s18 = sadd.s32 1, %s454_s15   ;;  %s26_s19 = sadd.s32 1, %s450_s14 }
   0x7   : > { %s23_s20 = ssub.s32 %s454_s15, %s503_s18  ;;  %p33_p0 = scmp.ne.s32.totalorder %s450_s14, %s446_s13 }
   0x8   : > { %p24_p1 = scmp.eq.s32.totalorder %s23_s20, 0  ;;  %p34_p2 = scmp.eq.s32.totalorder %s454_s15, 0 }
   0x9   : > { %p39_p3 = scmp.ne.s32.totalorder %s446_s13, %s442_s12  ;;  %p40_p4 = scmp.eq.s32.totalorder %s499_s16, 0 }
   0xa   : > { %s515_s21 = scalar_select %p24_p1, %s450_s14, %s26_s19  }
   0xb   : > { %p517_p5 = por %p34_p2, %p33_p0  ;;  %p521_p6 = por %p40_p4, %p39_p3 }
   0xc   : > { %p105_p7 = scmp.eq.s32.totalorder %s499_s16, 1  ;;  %p111_p8 = scmp.eq.s32.totalorder %s300_s17, 1 }
   0xd   : > { %s632_s23 = scalar_select %p521_p6, 1, 0 }
   0xe   : > { %p326_p10 = scmp.lt.s32.totalorder %s454_s15, 2  ;;  %p528_p11 = por %p105_p7, %p33_p0 }
   0xf   : > { %p532_p12 = por %p111_p8, %p39_p3  ;;  %s137_s26 = sand.u32 1, %s450_s14  }
  0x10   : > { %s633_s24 = scalar_select %p528_p11, 1, 0 }
  0x11   : > { %s634_s25 = scalar_select %p532_p12, 1, 0 }
  0x12   : > { %s304_s27 = sshll.u32 %s454_s15, 7  ;;  %s303_s28 = sshll.u32 %s137_s26, 3 }
  0x13   : > { %s541_s4 = scalar_lea.hbm %s625_s0, %s304_s27  ;;  %s141_s5 = scalar_lea.vmem [#allocation2], %s303_s28 }
  0x14   : > { %s148_s6 = sshll.u32 %s141_s5, 4  ;;  %p545_p13 = pnand %p326_p10, %p517_p5  ;;  %s549_s6 = int_to_ptr.vmem [resolvable:$true] %s148_s6 }
  0x15   : > { %s138_s8 = scalar_lea.sflag [#allocation3], %s137_s26  ;;  %s362_s9 = scalar_lea.hbm %s541_s4, 128 }
  0x16   : > { %p363_p2 = scmp.ne.s32.totalorder %s541_s4, %s362_s9  ;;  %p364_p3 = pneg %p545_p13 }
  0x17   : > { %s367_s17 = scalar_lea.hbm %s625_s0, 256  ;;  %p368_p5 = scmp.lt.s32.totalorder %s541_s4, %s625_s0 }
  0x18   : > { %p365_p4 = pnand %p364_p3, %p363_p2  ;;  %p369_p8 = scmp.lt.s32.totalorder %s367_s17, %s362_s9 }
  0x1a   : > { %p366_p7 = pneg %p365_p4  ;;  %p370_p10 = por %p369_p8, %p368_p5 }
  0x1c   : > { %p371_p9 = pnand %p370_p10, %p366_p7 }
  0x1e   : > { %374 = shalt.err (!%p371_p9)
}
  0x1f   : > { %s375_s22 = scalar_lea.vmem %s549_s6, 128  ;;  %s456_s26 = smov [#allocation2]  }
  0x20   : > { %p376_p0 = scmp.ne.s32.totalorder %s549_s6, %s375_s22  ;;  %s380_s27 = sshll.u32 %s456_s26, 4  ;;  %s381_s27 = int_to_ptr.vmem [resolvable:$false] %s380_s27 }
  0x21   : > { %s382_s28 = scalar_lea.vmem %s381_s27, 256  ;;  %p383_p4 = scmp.lt.s32.totalorder %s549_s6, %s381_s27 }
  0x22   : > { %p378_p1 = pnand %p376_p0, %p364_p3  ;;  %p384_p12 = scmp.lt.s32.totalorder %s382_s28, %s375_s22 }
  0x24   : > { %p379_p2 = pneg %p378_p1  ;;  %p385_p11 = por %p384_p12, %p383_p4 }
  0x26   : > { %p386_p6 = pnand %p385_p11, %p379_p2 }
  0x28   : > { %389 = shalt.err (!%p386_p6)
}
  0x29   : > { %321 = dma.hbm_to_vmem [thread:$0]  (!%p545_p13), %s541_s4, 128, %s549_s6, %s138_s8  }
  0x2a   : > { %p636_p9 = scmp.lt.s32.totalorder %s454_s15, 3  ;;  %p637_p7 = scmp.ge.s32.totalorder %s454_s15, 1 }
  0x2c   : > { %p154_p0 = pnand %p637_p7, %p636_p9 }
  0x2d   : > { %s576_s29 = sand.u32 (!%p154_p0), 1, %s446_s13   ;;  %p638_p6 = scmp.ne.s32.totalorder (!%p154_p0), %s632_s23, 0 }
  0x2e   : > { %157 = sbr.rel (%p154_p0) target bundleno = 372 (0x174), region = 32  ;;  %s306_s30 = sshll.u32 (!%p154_p0), %s576_s29, 3 }
  0x2f   : > { %s160_s5 = scalar_lea.sflag (!%p154_p0), [#allocation3], %s576_s29  ;;  %s163_s9 = scalar_lea.vmem (!%p154_p0), [#allocation2], %s306_s30 }
  0x33   : > { %433 = dma.done.wait (%p638_p6), %s160_s5, 128  }
  0x34   : > { %435 = vsyncadd (%p638_p6), %s160_s5, 4294967168  ;;  %v186_v0 = vld [vmem:[%s163_s9] sm:$0xff]  ;;  %s311_s8 = sshll.u32 %s499_s16, 7  ;;  %s185_s10 = scalar_lea.vmem [#allocation5], %s306_s30 }
  0x35   : > { %187 = vadd.xlane.f32.xlu0 %v186_v0  ;;  %v308_v9 = vld [vmem:[%s626_s1] ss:$0 sm:$0xff]  ;;  %s230_s11 = sshll.u32 %s185_s10, 4  ;;  %s228_s20 = scalar_lea.hbm %s628_s3, %s311_s8  ;;  %s231_s11 = int_to_ptr.vmem [resolvable:$true] %s230_s11 }
  0x36   : > { %v309_v11 = vld [vmem:[%s627_s2] ss:$0 sm:$0xff]  ;;  %s217_s22 = scalar_lea.sflag [#allocation4], %s576_s29  ;;  %s390_s26 = scalar_lea.vmem %s231_s11, 128 }
  0x37   : > { %p391_p11 = scmp.ne.s32.totalorder %s231_s11, %s390_s26  ;;  %p639_p12 = scmp.ne.s32.totalorder %s633_s24, 0 }
  0x38   : > { %s457_s27 = smov [#allocation5]  }
  0x39   : > { %p392_p13 = pnand %p391_p11, %p639_p12  ;;  %s394_s28 = sshll.u32 %s457_s27, 4  ;;  %s395_s28 = int_to_ptr.vmem [resolvable:$false] %s394_s28 }
  0x3a   : > { %s396_s16 = scalar_lea.vmem %s395_s28, 256  ;;  %p397_p3 = scmp.lt.s32.totalorder %s231_s11, %s395_s28 }
  0x3b   : > { %p393_p1 = pneg %p392_p13  ;;  %p398_p5 = scmp.lt.s32.totalorder %s396_s16, %s390_s26 }
  0x3d   : > { %p399_p8 = por %p398_p5, %p397_p3 }
  0x3f   : > { %p400_p10 = pnand %p399_p8, %p393_p1 }
  0xbe   : > { %v188_v1 = vpop.xlane.xlu0 %187 }
  0xbf   : > { %v190_v2 = vmul.f32 0.0078125, %v188_v1 }
  0xc1   : > { %v191_v3 = vsub.f32 %v186_v0, %v190_v2 }
  0xc3   : > { %v192_v4 = vmul.f32 %v191_v3, %v191_v3 }
  0xc5   : > { %193 = vadd.xlane.f32.xlu0 %v192_v4 }
 0x14e   : > { %v194_v5 = vpop.xlane.xlu0 %193 }
 0x14f   : > { %v195_v6 = vmul.f32 0.0078125, %v194_v5 }
 0x151   : > { %v196_v7 = vadd.f32 1e-05, %v195_v6 }
 0x153   : > { %360 = vrsqrt.f32 %v196_v7 }
 0x160   : > { %v361_v8 = vpop.eup %360 }
 0x161   : > { %v198_v10 = vmul.f32 %v361_v8, %v191_v3 }
 0x163   : > { %v206_v12 = vmul.f32 %v308_v9, %v198_v10 }
 0x165   : > { %v214_v13 = vadd.f32 %v309_v11, %v206_v12 }
 0x167   : > { %215 = vst [vmem:[%s185_s10] sm:$0xff] %v214_v13 }
 0x168   : > { %403 = shalt.err (!%p400_p10)
}
 0x169   : > { %s404_s30 = scalar_lea.hbm %s228_s20, 128  ;;  %s408_s9 = scalar_lea.hbm %s628_s3, 256 }
 0x16a   : > { %p405_p2 = scmp.ne.s32.totalorder %s228_s20, %s404_s30  ;;  %p409_p7 = scmp.lt.s32.totalorder %s228_s20, %s628_s3 }
 0x16b   : > { %p410_p0 = scmp.lt.s32.totalorder %s408_s9, %s404_s30 }
 0x16c   : > { %p406_p4 = pnand %p405_p2, %p639_p12 }
 0x16d   : > { %p411_p6 = por %p410_p0, %p409_p7 }
 0x16e   : > { %p407_p9 = pneg %p406_p4 }
 0x170   : > { %p412_p11 = pnand %p411_p6, %p407_p9 }
 0x172   : > { %415 = shalt.err (!%p412_p11)
}
 0x173   : > { %316 = dma.vmem_to_hbm [thread:$0]  (%p639_p12), %s231_s11, 128, %s228_s20, %s217_s22  }
 0x174 PF: > { %s242_s23 = sand.u32 1, %s442_s12   ;;  %p640_p13 = scmp.ne.s32.totalorder %s634_s25, 0 }
 0x175   : > { %p641_p1 = scmp.ge.s32.totalorder %s454_s15, 2  ;;  %s243_s7 = scalar_lea.sflag [#allocation4], %s242_s23 }
 0x177   : > { %p323_p3 = pnand %p641_p1, %p640_p13 }
 0x179   : > { %p324_p5 = pneg %p323_p3 }
 0x17b   : > { %437 = dma.done.wait (%p324_p5), %s243_s7, 128  }
 0x17c   : > { %439 = vsyncadd (%p324_p5), %s243_s7, 4294967168  ;;  %p16_p8 = scmp.ge.s32.totalorder %s503_s18, 4   ;;  %s642_s12 = smov %s446_s13 }
 0x17d   : > { %s643_s13 = smov %s450_s14  ;;  %s644_s14 = smov %s515_s21 }
 0x17e   : > { %s645_s15 = smov %s503_s18  ;;  %18 = sbr.rel (!%p16_p8) target bundleno = 5 (0x5), region = 77 }
 0x183   :  { %248 = vsyncpa [#allocation3], 1 }
 0x184   :  { %250 = vsyncpa [#allocation3 + $0x1], 1 }
 0x185   :  { %251 = vsyncpa [#allocation4], 1 }
 0x186   :  { %253 = vsyncpa [#allocation4 + $0x1], 1 }

</bundles_post_ra>
